<compile_context>
chip_gen: v5e
topology: v5e:2x2
jax: 0.10.0
libtpu: 0.0.40
codegen_flags: <defaults>
</compile_context>

<pallas_src>
import math
from functools import partial

import jax
import jax.numpy as jnp
from jax.experimental import pallas as pl
from jax.experimental.pallas import tpu as pltpu

_HIDDEN = 100        # logical hidden width (matches the PyTorch module)
_HIDDEN_PAD = 128    # lane-dense padded hidden width
_LANE = 128


def _round_up(x, m):
    return -(-x // m) * m


# ----------------------------------------------------------------------------
# Pallas kernel: fused 4-layer MLP (Linear/ReLU x3 + final Linear)
# ----------------------------------------------------------------------------
def _critic_mlp_kernel(x_ref, w1_ref, b1_ref, w2_ref, b2_ref,
                       w3_ref, b3_ref, w4_ref, b4_ref, o_ref):
    x = x_ref[...].astype(jnp.bfloat16)
    h = jnp.dot(x, w1_ref[...], preferred_element_type=jnp.float32) + b1_ref[...]
    h = jnp.maximum(h, 0.0)
    h = jnp.dot(h.astype(jnp.bfloat16), w2_ref[...],
                preferred_element_type=jnp.float32) + b2_ref[...]
    h = jnp.maximum(h, 0.0)
    h = jnp.dot(h.astype(jnp.bfloat16), w3_ref[...],
                preferred_element_type=jnp.float32) + b3_ref[...]
    h = jnp.maximum(h, 0.0)
    o_ref[...] = jnp.dot(h.astype(jnp.bfloat16), w4_ref[...],
                         preferred_element_type=jnp.float32) + b4_ref[...]


# ----------------------------------------------------------------------------
# Wrapper: tile the batch dimension, keep (padded) weights as full blocks
# ----------------------------------------------------------------------------
def _critic_mlp(x_pad, p, tm):
    m_pad, k = x_pad.shape
    a_pad = p["w4"].shape[1]
    full = lambda i: (0, 0)
    return pl.pallas_call(
        _critic_mlp_kernel,
        out_shape=jax.ShapeDtypeStruct((m_pad, a_pad), jnp.float32),
        grid=(m_pad // tm,),
        in_specs=[
            pl.BlockSpec((tm, k), lambda i: (i, 0)),
            pl.BlockSpec(p["w1"].shape, full),
            pl.BlockSpec(p["b1"].shape, full),
            pl.BlockSpec(p["w2"].shape, full),
            pl.BlockSpec(p["b2"].shape, full),
            pl.BlockSpec(p["w3"].shape, full),
            pl.BlockSpec(p["b3"].shape, full),
            pl.BlockSpec(p["w4"].shape, full),
            pl.BlockSpec(p["b4"].shape, full),
        ],
        out_specs=pl.BlockSpec((tm, a_pad), lambda i: (i, 0)),
        compiler_params=pltpu.CompilerParams(
            dimension_semantics=("parallel",)),
    )(x_pad, p["w1"], p["b1"], p["w2"], p["b2"],
      p["w3"], p["b3"], p["w4"], p["b4"])


# ----------------------------------------------------------------------------
# Parameter construction (PyTorch-default uniform init), padded + bf16 weights
# ----------------------------------------------------------------------------
def init_critic_network_params(key, n_states, n_actions):
    a_pad = _round_up(n_actions, _LANE)

    def linear(k, fan_in, fan_out, in_pad, out_pad):
        kw, kb = jax.random.split(k)
        bound = 1.0 / math.sqrt(fan_in)
        w = jax.random.uniform(kw, (fan_in, fan_out), jnp.float32, -bound, bound)
        b = jax.random.uniform(kb, (fan_out,), jnp.float32, -bound, bound)
        w = jnp.pad(w, ((0, in_pad - fan_in), (0, out_pad - fan_out)))
        b = jnp.pad(b, (0, out_pad - fan_out)).reshape(1, out_pad)
        return w.astype(jnp.bfloat16), b.astype(jnp.float32)

    k1, k2, k3, k4 = jax.random.split(key, 4)
    w1, b1 = linear(k1, n_states, _HIDDEN, n_states, _HIDDEN_PAD)
    w2, b2 = linear(k2, _HIDDEN, _HIDDEN, _HIDDEN_PAD, _HIDDEN_PAD)
    w3, b3 = linear(k3, _HIDDEN, _HIDDEN, _HIDDEN_PAD, _HIDDEN_PAD)
    w4, b4 = linear(k4, _HIDDEN, n_actions, _HIDDEN_PAD, a_pad)
    # Zero-padded hidden columns stay exactly zero through ReLU (bias pad = 0)
    # and the zero-padded input rows of the next weight ignore them, so the
    # padded network is numerically identical to the 100-wide one.
    return {"w1": w1, "b1": b1, "w2": w2, "b2": b2,
            "w3": w3, "b3": b3, "w4": w4, "b4": b4}


# ----------------------------------------------------------------------------
# Forward pass (matches CriticNetwork.forward semantics: returns raw Q-values)
# ----------------------------------------------------------------------------
@partial(jax.jit, static_argnames=("n_actions",))
def critic_network_forward(params, states, n_actions):
    states = states.astype(jnp.float32)
    m, _ = states.shape
    # Batch tile: 256 rows for big batches, otherwise one sublane-aligned block.
    tm = 256 if m > 256 else _round_up(max(m, 8), 8)
    m_pad = _round_up(m, tm)
    if m_pad != m:
        states = jnp.pad(states, ((0, m_pad - m), (0, 0)))
    out = _critic_mlp(states, params, tm)      # (m_pad, a_pad) f32
    return out[:m, :n_actions]


# ----------------------------------------------------------------------------
if __name__ == "__main__":
    key = jax.random.PRNGKey(0)
    n_states = 10
    n_actions = 6
    batch = 2

    k_params, k_x = jax.random.split(key)
    params = init_critic_network_params(k_params, n_states, n_actions)
    states = jax.random.normal(k_x, (batch, n_states), dtype=jnp.float32)

    q = critic_network_forward(params, states, n_actions)
    q = jax.block_until_ready(q)

    assert q.shape == (batch, n_actions), q.shape
    assert bool(jnp.all(jnp.isfinite(q)))

    # Pure-JAX reference using identical (bf16-in / f32-accumulate) arithmetic.
    def ref(p, x):
        h = jnp.dot(x.astype(jnp.bfloat16), p["w1"],
                    preferred_element_type=jnp.float32) + p["b1"]
        h = jnp.maximum(h, 0.0)
        h = jnp.dot(h.astype(jnp.bfloat16), p["w2"],
                    preferred_element_type=jnp.float32) + p["b2"]
        h = jnp.maximum(h, 0.0)
        h = jnp.dot(h.astype(jnp.bfloat16), p["w3"],
                    preferred_element_type=jnp.float32) + p["b3"]
        h = jnp.maximum(h, 0.0)
        o = jnp.dot(h.astype(jnp.bfloat16), p["w4"],
                    preferred_element_type=jnp.float32) + p["b4"]
        return o[:, :n_actions]

    expected = ref(params, states)
    assert jnp.allclose(q, expected, atol=1e-2, rtol=1e-2)

    print("KERNEL_OK")
</pallas_src>

<mosaic_0001>
module attributes {stable_mosaic.version = 11 : i64} {
  func.func @_critic_mlp_kernel(%arg0: i32, %arg1: memref<8x10xf32, #tpu.memory_space<vmem>>, %arg2: memref<10x128xbf16, #tpu.memory_space<vmem>>, %arg3: memref<1x128xf32, #tpu.memory_space<vmem>>, %arg4: memref<128x128xbf16, #tpu.memory_space<vmem>>, %arg5: memref<1x128xf32, #tpu.memory_space<vmem>>, %arg6: memref<128x128xbf16, #tpu.memory_space<vmem>>, %arg7: memref<1x128xf32, #tpu.memory_space<vmem>>, %arg8: memref<128x128xbf16, #tpu.memory_space<vmem>>, %arg9: memref<1x128xf32, #tpu.memory_space<vmem>>, %arg10: memref<8x128xf32, #tpu.memory_space<vmem>>) attributes {dimension_semantics = [#tpu.dimension_semantics<parallel>], iteration_bounds = array<i64: 1>, scalar_prefetch = 0 : i64, scratch_operands = 0 : i64, tpu.core_type = #tpu.core_type<tc>, window_params = [{transform_indices = @transform_0, window_bounds = array<i64: 8, 10>}, {pipeline_mode = #tpu.pipeline_mode<synchronous>, transform_indices = @transform_1, window_bounds = array<i64: 10, 128>}, {pipeline_mode = #tpu.pipeline_mode<synchronous>, transform_indices = @transform_2, window_bounds = array<i64: 1, 128>}, {pipeline_mode = #tpu.pipeline_mode<synchronous>, transform_indices = @transform_3, window_bounds = array<i64: 128, 128>}, {pipeline_mode = #tpu.pipeline_mode<synchronous>, transform_indices = @transform_4, window_bounds = array<i64: 1, 128>}, {pipeline_mode = #tpu.pipeline_mode<synchronous>, transform_indices = @transform_5, window_bounds = array<i64: 128, 128>}, {pipeline_mode = #tpu.pipeline_mode<synchronous>, transform_indices = @transform_6, window_bounds = array<i64: 1, 128>}, {pipeline_mode = #tpu.pipeline_mode<synchronous>, transform_indices = @transform_7, window_bounds = array<i64: 128, 128>}, {pipeline_mode = #tpu.pipeline_mode<synchronous>, transform_indices = @transform_8, window_bounds = array<i64: 1, 128>}, {transform_indices = @transform_9, window_bounds = array<i64: 8, 128>}]} {
    %c0 = arith.constant 0 : index
    %c0_0 = arith.constant 0 : index
    %0 = vector.load %arg1[%c0, %c0_0] : memref<8x10xf32, #tpu.memory_space<vmem>>, vector<8x10xf32>
    %1 = arith.truncf %0 : vector<8x10xf32> to vector<8x10xbf16>
    %c0_1 = arith.constant 0 : index
    %c0_2 = arith.constant 0 : index
    %2 = vector.load %arg2[%c0_1, %c0_2] : memref<10x128xbf16, #tpu.memory_space<vmem>>, vector<10x128xbf16>
    %cst = arith.constant dense<0.000000e+00> : vector<8x128xf32>
    %3 = tpu.matmul %1, %2, %cst {dimension_numbers = #tpu.dot_dimension_numbers<[1], [0], [0], [1], [0, 0, 1, 1], [], []>} : vector<8x10xbf16>, vector<10x128xbf16>, vector<8x128xf32> -> vector<8x128xf32>
    %c0_3 = arith.constant 0 : index
    %c0_4 = arith.constant 0 : index
    %4 = vector.load %arg3[%c0_3, %c0_4] : memref<1x128xf32, #tpu.memory_space<vmem>>, vector<1x128xf32>
    %5 = vector.broadcast %4 : vector<1x128xf32> to vector<8x128xf32>
    %6 = arith.addf %3, %5 : vector<8x128xf32>
    %cst_5 = arith.constant 0.000000e+00 : f32
    %7 = vector.broadcast %cst_5 : f32 to vector<8x128xf32>
    %8 = arith.maximumf %6, %7 : vector<8x128xf32>
    %9 = arith.truncf %8 : vector<8x128xf32> to vector<8x128xbf16>
    %c0_6 = arith.constant 0 : index
    %c0_7 = arith.constant 0 : index
    %10 = vector.load %arg4[%c0_6, %c0_7] : memref<128x128xbf16, #tpu.memory_space<vmem>>, vector<128x128xbf16>
    %cst_8 = arith.constant dense<0.000000e+00> : vector<8x128xf32>
    %11 = tpu.matmul %9, %10, %cst_8 {dimension_numbers = #tpu.dot_dimension_numbers<[1], [0], [0], [1], [0, 0, 1, 1], [], []>} : vector<8x128xbf16>, vector<128x128xbf16>, vector<8x128xf32> -> vector<8x128xf32>
    %c0_9 = arith.constant 0 : index
    %c0_10 = arith.constant 0 : index
    %12 = vector.load %arg5[%c0_9, %c0_10] : memref<1x128xf32, #tpu.memory_space<vmem>>, vector<1x128xf32>
    %13 = vector.broadcast %12 : vector<1x128xf32> to vector<8x128xf32>
    %14 = arith.addf %11, %13 : vector<8x128xf32>
    %cst_11 = arith.constant 0.000000e+00 : f32
    %15 = vector.broadcast %cst_11 : f32 to vector<8x128xf32>
    %16 = arith.maximumf %14, %15 : vector<8x128xf32>
    %17 = arith.truncf %16 : vector<8x128xf32> to vector<8x128xbf16>
    %c0_12 = arith.constant 0 : index
    %c0_13 = arith.constant 0 : index
    %18 = vector.load %arg6[%c0_12, %c0_13] : memref<128x128xbf16, #tpu.memory_space<vmem>>, vector<128x128xbf16>
    %cst_14 = arith.constant dense<0.000000e+00> : vector<8x128xf32>
    %19 = tpu.matmul %17, %18, %cst_14 {dimension_numbers = #tpu.dot_dimension_numbers<[1], [0], [0], [1], [0, 0, 1, 1], [], []>} : vector<8x128xbf16>, vector<128x128xbf16>, vector<8x128xf32> -> vector<8x128xf32>
    %c0_15 = arith.constant 0 : index
    %c0_16 = arith.constant 0 : index
    %20 = vector.load %arg7[%c0_15, %c0_16] : memref<1x128xf32, #tpu.memory_space<vmem>>, vector<1x128xf32>
    %21 = vector.broadcast %20 : vector<1x128xf32> to vector<8x128xf32>
    %22 = arith.addf %19, %21 : vector<8x128xf32>
    %cst_17 = arith.constant 0.000000e+00 : f32
    %23 = vector.broadcast %cst_17 : f32 to vector<8x128xf32>
    %24 = arith.maximumf %22, %23 : vector<8x128xf32>
    %25 = arith.truncf %24 : vector<8x128xf32> to vector<8x128xbf16>
    %c0_18 = arith.constant 0 : index
    %c0_19 = arith.constant 0 : index
    %26 = vector.load %arg8[%c0_18, %c0_19] : memref<128x128xbf16, #tpu.memory_space<vmem>>, vector<128x128xbf16>
    %cst_20 = arith.constant dense<0.000000e+00> : vector<8x128xf32>
    %27 = tpu.matmul %25, %26, %cst_20 {dimension_numbers = #tpu.dot_dimension_numbers<[1], [0], [0], [1], [0, 0, 1, 1], [], []>} : vector<8x128xbf16>, vector<128x128xbf16>, vector<8x128xf32> -> vector<8x128xf32>
    %c0_21 = arith.constant 0 : index
    %c0_22 = arith.constant 0 : index
    %28 = vector.load %arg9[%c0_21, %c0_22] : memref<1x128xf32, #tpu.memory_space<vmem>>, vector<1x128xf32>
    %29 = vector.broadcast %28 : vector<1x128xf32> to vector<8x128xf32>
    %30 = arith.addf %27, %29 : vector<8x128xf32>
    %c0_23 = arith.constant 0 : index
    %c0_24 = arith.constant 0 : index
    %31 = vector.load %arg10[%c0_23, %c0_24] : memref<8x128xf32, #tpu.memory_space<vmem>>, vector<8x128xf32>
    tpu.vector_store %arg10[%c0_23, %c0_24], %30 {strides = array<i32>} : memref<8x128xf32, #tpu.memory_space<vmem>>, vector<8x128xf32>,
    return
  }
  func.func @transform_0(%arg0: i32) -> (i32, i32) {
    %c0_i32 = arith.constant 0 : i32
    %c0_i32_0 = arith.constant 0 : i32
    return %arg0, %c0_i32 : i32, i32
  }
  func.func @transform_1(%arg0: i32) -> (i32, i32) {
    %c0_i32 = arith.constant 0 : i32
    %c0_i32_0 = arith.constant 0 : i32
    %c0_i32_1 = arith.constant 0 : i32
    return %c0_i32, %c0_i32_0 : i32, i32
  }
  func.func @transform_2(%arg0: i32) -> (i32, i32) {
    %c0_i32 = arith.constant 0 : i32
    %c0_i32_0 = arith.constant 0 : i32
    %c0_i32_1 = arith.constant 0 : i32
    return %c0_i32, %c0_i32_0 : i32, i32
  }
  func.func @transform_3(%arg0: i32) -> (i32, i32) {
    %c0_i32 = arith.constant 0 : i32
    %c0_i32_0 = arith.constant 0 : i32
    %c0_i32_1 = arith.constant 0 : i32
    return %c0_i32, %c0_i32_0 : i32, i32
  }
  func.func @transform_4(%arg0: i32) -> (i32, i32) {
    %c0_i32 = arith.constant 0 : i32
    %c0_i32_0 = arith.constant 0 : i32
    %c0_i32_1 = arith.constant 0 : i32
    return %c0_i32, %c0_i32_0 : i32, i32
  }
  func.func @transform_5(%arg0: i32) -> (i32, i32) {
    %c0_i32 = arith.constant 0 : i32
    %c0_i32_0 = arith.constant 0 : i32
    %c0_i32_1 = arith.constant 0 : i32
    return %c0_i32, %c0_i32_0 : i32, i32
  }
  func.func @transform_6(%arg0: i32) -> (i32, i32) {
    %c0_i32 = arith.constant 0 : i32
    %c0_i32_0 = arith.constant 0 : i32
    %c0_i32_1 = arith.constant 0 : i32
    return %c0_i32, %c0_i32_0 : i32, i32
  }
  func.func @transform_7(%arg0: i32) -> (i32, i32) {
    %c0_i32 = arith.constant 0 : i32
    %c0_i32_0 = arith.constant 0 : i32
    %c0_i32_1 = arith.constant 0 : i32
    return %c0_i32, %c0_i32_0 : i32, i32
  }
  func.func @transform_8(%arg0: i32) -> (i32, i32) {
    %c0_i32 = arith.constant 0 : i32
    %c0_i32_0 = arith.constant 0 : i32
    %c0_i32_1 = arith.constant 0 : i32
    return %c0_i32, %c0_i32_0 : i32, i32
  }
  func.func @transform_9(%arg0: i32) -> (i32, i32) {
    %c0_i32 = arith.constant 0 : i32
    %c0_i32_0 = arith.constant 0 : i32
    return %arg0, %c0_i32 : i32, i32
  }
}

</mosaic_0001>

<bundles_post_ra>
// kernel: critic_network_forward.1
= control target key start
LH: loop header
LB: loop body
LE: loop exit
PB: predicated region body
PF: predicated region fallthrough
CT: control target
= control target key end

     0   :  { %14 = vsyncpa [#allocation3], 0  ;;  %s669_s0 = inlined_call_operand.vmem [shape: f32[8,10], index: 0, kind: input, shape index: {}]   ;;  %s670_s1 = inlined_call_operand.vmem [shape: bf16[10,128], index: 1, kind: input, shape index: {}]   ;;  %s671_s2 = inlined_call_operand.vmem [shape: f32[1,128], index: 2, kind: input, shape index: {}]   ;;  %s672_s3 = inlined_call_operand.hbm [shape: bf16[128,128], index: 3, kind: input, shape index: {}]   ;;  %s673_s4 = inlined_call_operand.vmem [shape: f32[1,128], index: 4, kind: input, shape index: {}]   ;;  %s674_s5 = inlined_call_operand.hbm [shape: bf16[128,128], index: 5, kind: input, shape index: {}]   ;;  %s675_s6 = inlined_call_operand.vmem [shape: f32[1,128], index: 6, kind: input, shape index: {}]   ;;  %s676_s7 = inlined_call_operand.hbm [shape: bf16[128,128], index: 7, kind: input, shape index: {}]   ;;  %s677_s8 = inlined_call_operand.vmem [shape: f32[1,128], index: 8, kind: input, shape index: {}]   ;;  %s678_s9 = inlined_call_operand.vmem [shape: f32[8,128], index: 9, kind: output, shape index: {}]  }
   0x1   :  { %15 = vsyncpa [#allocation5], 0  ;;  %s41_s11 = sshll.u32 %s674_s5, 4  ;;  %s581_s12 = smov [#allocation4]   ;;  %s42_s11 = int_to_ptr.hbm [resolvable:$true] %s41_s11 }
   0x2   :  { %s43_s13 = sshll.u32 %s581_s12, 4  ;;  %s26_s16 = sshll.u32 %s672_s3, 4  ;;  %s44_s13 = int_to_ptr.vmem [resolvable:$true] %s43_s13  ;;  %s27_s16 = int_to_ptr.hbm [resolvable:$true] %s26_s16 }
   0x3   :  { %s582_s17 = smov 64   ;;  %s583_s18 = smov 4  }
   0x4   :  { %49 = dma.hbm_to_vmem [thread:$0]  %s42_s11, 1024, %s44_s13, [#allocation5], %s582_s17, %s582_s17, %s583_s18  }
   0x5   :  { %s584_s19 = smov [#allocation2]   ;;  %s56_s23 = sshll.u32 %s676_s7, 4  ;;  %s57_s23 = int_to_ptr.hbm [resolvable:$true] %s56_s23 }
   0x6   :  { %s28_s20 = sshll.u32 %s584_s19, 4  ;;  %s585_s5 = smov [#allocation6]   ;;  %s29_s20 = int_to_ptr.vmem [resolvable:$true] %s28_s20 }
   0x7   :  { %34 = dma.hbm_to_vmem [thread:$0]  %s27_s16, 1024, %s29_s20, [#allocation3], %s582_s17, %s582_s17, %s583_s18  }
   0x8   :  { %s58_s24 = sshll.u32 %s585_s5, 4  ;;  %s59_s24 = int_to_ptr.vmem [resolvable:$true] %s58_s24 }
   0x9   :  { %64 = dma.hbm_to_vmem [thread:$0]  %s57_s23, 1024, %s59_s24, [#allocation5], %s582_s17, %s582_s17, %s583_s18  }
   0xa   :  { %577 = dma.done.wait [#allocation3], 1024  }
   0xb   :  { %578 = vsyncadd [#allocation3], 4294966272 }
   0xc   :  { %579 = dma.done.wait [#allocation5], 2048  }
   0xd   :  { %580 = vsyncadd [#allocation5], 4294965248  ;;  %v372_v0 = vld [vmem:[%s670_s1] sm:$0xf]  ;;  %v471_v1 = vld [vmem:[%s670_s1] sm:$0x10] }
   0xe   :  { %vm97_vm0 = vcmask 1044480   ;;  %v80_v2 = vld [vmem:[%s669_s0] sm:$0xff]  ;;  %v373_v3 = vor.u32 %v471_v1, %v372_v0  ;;  %v479_v4 = vld [vmem:[#allocation2 + $0x38] sm:$0xff]  ;;  %vm93_vm1 = vcmask 80896   ;;  %v478_v7 = vld [vmem:[#allocation2 + $0x30] sm:$0xff] }
   0xf   :  { %v81_v6 = vpack.c.bf16 %v80_v2, %v80_v2  ;;  %184 = vmatpush.bf16.msra.mxu1 %v479_v4  ;;  %v477_v8 = vld [vmem:[#allocation2 + $0x28] sm:$0xff]  ;;  %v476_v9 = vld [vmem:[#allocation2 + $0x20] sm:$0xff]  ;;  %v475_v10 = vld [vmem:[#allocation2 + $0x18] sm:$0xff] }
  0x10   :  { %v99_v5 = vsel %vm97_vm0, %v373_v3, 0  ;;  %v474_v11 = vld [vmem:[#allocation2 + $0x10] sm:$0xff]  ;;  %v473_v12 = vld [vmem:[#allocation2 + $0x8] sm:$0xff]  ;;  %v472_v13 = vld [vmem:[#allocation2] sm:$0xff] }
  0x11   :  { %108 = vmatpush.bf16.msra.mxu0 %v99_v5  ;;  %v487_v14 = vld [vmem:[#allocation4 + $0x38] sm:$0xff]  ;;  %v486_v15 = vld [vmem:[#allocation4 + $0x30] sm:$0xff]  ;;  %v485_v16 = vld [vmem:[#allocation4 + $0x28] sm:$0xff] }
  0x12   :  { %267 = vmatpush.bf16.msra.mxu2 %v487_v14  ;;  %v484_v17 = vld [vmem:[#allocation4 + $0x20] sm:$0xff]  ;;  %v483_v18 = vld [vmem:[#allocation4 + $0x18] sm:$0xff]  ;;  %v482_v19 = vld [vmem:[#allocation4 + $0x10] sm:$0xff] }
  0x13   :  { %185 = vmatpush.bf16.msra.mxu1 %v478_v7  ;;  %v501_v20 = vld [vmem:[%s671_s2] ss:$0 sm:$0xff]  ;;  %v481_v26 = vld [vmem:[#allocation4 + $0x8] sm:$0xff]  ;;  %v495_v28 = vld [vmem:[#allocation6 + $0x38] sm:$0xff] }
  0x14   :  { %374 = vmatmul.msk.bf16.vlgmr.msra.gmra.mxu0 %vm93_vm1, %v81_v6  ;;  %v480_v27 = vld [vmem:[#allocation4] sm:$0xff]  ;;  %350 = vmatpush.bf16.msra.mxu3 %v495_v28  ;;  %v494_v29 = vld [vmem:[#allocation6 + $0x30] sm:$0xff]  ;;  %v493_v30 = vld [vmem:[#allocation6 + $0x28] sm:$0xff] }
  0x15   :  { %v492_v31 = vld [vmem:[#allocation6 + $0x20] sm:$0xff]  ;;  %v491_v32 = vld [vmem:[#allocation6 + $0x18] sm:$0xff]  ;;  %v490_v33 = vld [vmem:[#allocation6 + $0x10] sm:$0xff] }
  0x16   :  { %268 = vmatpush.bf16.msra.mxu2 %v486_v15  ;;  %v502_v34 = vld [vmem:[%s673_s4] ss:$0 sm:$0xff]  ;;  %v489_v40 = vld [vmem:[#allocation6 + $0x8] sm:$0xff] }
  0x17   :  { %186 = vmatpush.bf16.msra.mxu1 %v477_v8  ;;  %v488_v41 = vld [vmem:[#allocation6] sm:$0xff] }
  0x18   :  { %351 = vmatpush.bf16.msra.mxu3 %v494_v29  ;;  %v503_v42 = vld [vmem:[%s675_s6] ss:$0 sm:$0xff] }
  0x19   :  { %v504_v48 = vld [vmem:[%s677_s8] ss:$0 sm:$0xff] }
  0x1a   :  { %269 = vmatpush.bf16.msra.mxu2 %v485_v16 }
  0x1b   :  { %187 = vmatpush.bf16.msra.mxu1 %v476_v9 }
  0x1c   :  { %352 = vmatpush.bf16.msra.mxu3 %v493_v30 }
  0x1e   :  { %270 = vmatpush.bf16.msra.mxu2 %v484_v17 }
  0x1f   :  { %188 = vmatpush.bf16.msra.mxu1 %v475_v10 }
  0x20   :  { %353 = vmatpush.bf16.msra.mxu3 %v492_v31 }
  0x22   :  { %271 = vmatpush.bf16.msra.mxu2 %v483_v18 }
  0x23   :  { %189 = vmatpush.bf16.msra.mxu1 %v474_v11 }
  0x24   :  { %354 = vmatpush.bf16.msra.mxu3 %v491_v32 }
  0x26   :  { %272 = vmatpush.bf16.msra.mxu2 %v482_v19 }
  0x27   :  { %190 = vmatpush.bf16.msra.mxu1 %v473_v12 }
  0x28   :  { %355 = vmatpush.bf16.msra.mxu3 %v490_v33 }
  0x2a   :  { %273 = vmatpush.bf16.msra.mxu2 %v481_v26 }
  0x2b   :  { %191 = vmatpush.bf16.msra.mxu1 %v472_v13 }
  0x2c   :  { %356 = vmatpush.bf16.msra.mxu3 %v489_v40 }
  0x2e   :  { %274 = vmatpush.bf16.msra.mxu2 %v480_v27 }
  0x30   :  { %357 = vmatpush.bf16.msra.mxu3 %v488_v41 }
  0x91   :  { %v110_v21 = vpop.f32.mrf.mxu0 }
  0x92   :  { %v111_v22 = vadd.f32 %v501_v20, %v110_v21 }
  0x94   :  { %v114_v23 = vmax.f32 %v111_v22, 0.0 }
  0x96   :  { %v115_v24 = vpack.c.bf16 %v114_v23, %v114_v23 }
  0x98   :  { %192 = vmatmul.bf16.vlgmr.msra.gmra.mxu1 %v115_v24 }
  0x99   :  { %v112_v25 = vpop.f32.mrf.mxu0 }
 0x115   :  { %v193_v35 = vpop.f32.mrf.mxu1 }
 0x116   :  { %v194_v36 = vadd.f32 %v502_v34, %v193_v35 }
 0x118   :  { %v197_v37 = vmax.f32 %v194_v36, 0.0 }
 0x11a   :  { %v198_v38 = vpack.c.bf16 %v197_v37, %v197_v37 }
 0x11c   :  { %275 = vmatmul.bf16.vlgmr.msra.gmra.mxu2 %v198_v38 }
 0x11d   :  { %v195_v39 = vpop.f32.mrf.mxu1 }
 0x19f   :  { %v276_v43 = vpop.f32.mrf.mxu2 }
 0x1a0   :  { %v277_v44 = vadd.f32 %v503_v42, %v276_v43 }
 0x1a2   :  { %v280_v45 = vmax.f32 %v277_v44, 0.0 }
 0x1a4   :  { %v281_v46 = vpack.c.bf16 %v280_v45, %v280_v45 }
 0x1a6   :  { %358 = vmatmul.bf16.vlgmr.msra.gmra.mxu3 %v281_v46 }
 0x1a7   :  { %v278_v47 = vpop.f32.mrf.mxu2 }
 0x229   :  { %v359_v49 = vpop.f32.mrf.mxu3 }
 0x22a   :  { %v360_v50 = vadd.f32 %v504_v48, %v359_v49 }
 0x22c   :  { %363 = vst [vmem:[%s678_s9] sm:$0xff] %v360_v50 }
 0x231   :  { %v361_v51 = vpop.f32.mrf.mxu3 }
 0x232   :  { %368 = vsyncpa [#allocation3], 1 }
 0x233   :  { %369 = vsyncpa [#allocation5], 1 }

</bundles_post_ra>
